<compile_context>
chip_gen: v7x
topology: tpu7x:2x2x1
jax: 0.10.0
libtpu: 0.0.40
codegen_flags: <defaults>
</compile_context>

<pallas_src>
import jax
import jax.numpy as jnp
from jax import lax
from jax.experimental import pallas as pl
from jax.experimental.pallas import tpu as pltpu


# ---------------------------------------------------------------------------
# VMEM budgeting (per generation: v5e/v6e = 128 MiB physical, v7x = 64 MiB)
# ---------------------------------------------------------------------------
def _physical_vmem_bytes():
    try:
        info = pltpu.get_tpu_info()
        for attr in ("vmem_capacity_bytes", "vmem_size_bytes", "vmem_bytes"):
            v = getattr(info, attr, None)
            if v:
                return int(v)
    except Exception:
        pass
    return 64 << 20  # conservative default (v7x per-TensorCore VMEM)


def _vmem_limits():
    phys = _physical_vmem_bytes()
    # Raise scoped VMEM above the 16/32 MiB defaults but leave headroom:
    #   128 MiB parts (v5e/v6e) -> 96 MiB limit, 48 MiB tile budget
    #    64 MiB parts (v7x)     -> 48 MiB limit, 24 MiB tile budget
    vmem_limit = int(min(phys * 3 // 4, 112 << 20))
    tile_budget = vmem_limit // 2  # target for the double-buffered working set
    return vmem_limit, tile_budget


def _pick_tile(N, F, x_bytes, tile_budget):
    """Largest lane tile (multiple of 128) whose double-buffered working set
    fits `tile_budget`, capped so the grid has >= 2 steps whenever possible
    (megacore sharding + DMA/compute overlap)."""
    # Worst case is kernel 2: 2 buffers x [x in + out (N rows, x dtype each)
    # + f32 magnitude row + int8 mask row] per lane.
    per_lane = 2 * (2 * N * x_bytes + 4 + 1)
    tF = max((tile_budget // per_lane) // 128 * 128, 128)
    F128 = pl.cdiv(F, 128) * 128
    if F128 >= 256:  # keep at least 2 grid iterations when the slab allows it
        tF = min(tF, max((F128 // 2) // 128 * 128, 128))
    return min(tF, F128)


# ---------------------------------------------------------------------------
# Kernel 1: importance = mean_over_batch(|x|);
#           magnitude' = alpha * magnitude + beta * importance
#           (alpha = t/(t+1), beta = 1/(t+1) precomputed on host)
# ---------------------------------------------------------------------------
def _magnitude_update_kernel(ab_ref, x_ref, mag_ref, new_mag_ref):
    alpha = ab_ref[0]                                   # scalars (SMEM)
    beta = ab_ref[1]
    absx = jnp.abs(x_ref[...].astype(jnp.float32))      # (N, tF)
    imp = jnp.mean(absx, axis=0, keepdims=True)         # (1, tF)
    new_mag_ref[...] = alpha * mag_ref[...] + beta * imp


# ---------------------------------------------------------------------------
# Kernel 2: mask = magnitude' >= threshold (int8);
#           out  = x * mask  (select in the input dtype, broadcast over N)
# ---------------------------------------------------------------------------
def _prune_mul_kernel(thr_ref, x_ref, mag_ref, out_ref, mask_ref):
    thr = thr_ref[0]                                    # scalar (SMEM)
    keep = mag_ref[...] >= thr                          # (1, tF) bool
    mask_ref[...] = keep.astype(jnp.int8)
    out_ref[...] = x_ref[...] * keep.astype(x_ref.dtype)


def magnitude_pruning_forward(x, sparsity, mask, magnitude, t, donate_x=False):
    """One training-mode forward step of MagnitudePruningCallback.

    Args:
      x:         (N, C, H, W) activation (NCHW), float32 or bfloat16.
      sparsity:  python float, target sparsity.
      mask:      (1, C, H, W) bool   current mask (ignored; refreshed here).
      magnitude: (1, C, H, W) float32 running-average magnitude statistic.
      t:         python int, current step counter (value of self.t before update).
      donate_x:  alias x's HBM buffer into the output (only if the caller does
                 not need x afterwards).

    Returns: (out, new_mask, new_magnitude, new_t)
    """
    N, C, H, W = x.shape
    F = C * H * W
    x_bytes = jnp.dtype(x.dtype).itemsize

    vmem_limit, tile_budget = _vmem_limits()
    tF = _pick_tile(N, F, x_bytes, tile_budget)
    Fp = pl.cdiv(F, tF) * tF              # lane-padded feature extent
    grid = (Fp // tF,)

    x2 = x.reshape(N, F)
    mag2 = magnitude.reshape(1, F)
    if Fp != F:                            # pad so every block is full
        x2 = jnp.pad(x2, ((0, 0), (0, Fp - F)))
        mag2 = jnp.pad(mag2, ((0, 0), (0, Fp - F)))

    t_f = float(t)
    ab_arr = jnp.asarray([t_f / (t_f + 1.0), 1.0 / (t_f + 1.0)], dtype=jnp.float32)

    smem_spec = pl.BlockSpec(memory_space=pltpu.MemorySpace.SMEM)
    cparams = pltpu.CompilerParams(
        dimension_semantics=("parallel",),
        vmem_limit_bytes=vmem_limit,
    )

    # --- running-average magnitude update (batch abs-mean reduction) ---------
    new_mag2 = pl.pallas_call(
        _magnitude_update_kernel,
        out_shape=jax.ShapeDtypeStruct((1, Fp), jnp.float32),
        grid_spec=pltpu.PrefetchScalarGridSpec(
            num_scalar_prefetch=0,
            grid=grid,
            in_specs=[
                smem_spec,
                pl.BlockSpec((N, tF), lambda i: (0, i)),
                pl.BlockSpec((1, tF), lambda i: (0, i)),
            ],
            out_specs=pl.BlockSpec((1, tF), lambda i: (0, i)),
        ),
        compiler_params=cparams,
    )(ab_arr, x2, mag2)

    # --- exact torch order-statistic threshold via top_k glue ------------------
    n = F
    idx = min(max(int(sparsity * n - 1), 0), n - 1)
    flat = new_mag2[0, :F]
    k_high = n - idx          # threshold = (n-idx)-th largest value
    k_low = idx + 1           # threshold = (idx+1)-th smallest value
    if k_high <= k_low:
        threshold = jnp.min(lax.top_k(flat, k_high)[0])
    else:
        threshold = -jnp.min(lax.top_k(-flat, k_low)[0])
    thr_arr = threshold.reshape(1).astype(jnp.float32)

    # --- mask refresh + broadcast multiply ------------------------------------
    io_alias = {1: 0} if donate_x else {}
    out2, mask2 = pl.pallas_call(
        _prune_mul_kernel,
        out_shape=(
            jax.ShapeDtypeStruct((N, Fp), x.dtype),
            jax.ShapeDtypeStruct((1, Fp), jnp.int8),
        ),
        grid_spec=pltpu.PrefetchScalarGridSpec(
            num_scalar_prefetch=0,
            grid=grid,
            in_specs=[
                smem_spec,
                pl.BlockSpec((N, tF), lambda i: (0, i)),
                pl.BlockSpec((1, tF), lambda i: (0, i)),
            ],
            out_specs=(
                pl.BlockSpec((N, tF), lambda i: (0, i)),
                pl.BlockSpec((1, tF), lambda i: (0, i)),
            ),
        ),
        compiler_params=cparams,
        input_output_aliases=io_alias,
    )(thr_arr, x2, new_mag2)

    if Fp != F:
        out2 = out2[:, :F]
        mask2 = mask2[:, :F]
        new_mag2 = new_mag2[:, :F]

    out = out2.reshape(N, C, H, W)
    new_mask = mask2.reshape(1, C, H, W).astype(jnp.bool_)
    new_magnitude = new_mag2.reshape(1, C, H, W)
    return out, new_mask, new_magnitude, t + 1


def _reference(x, sparsity, magnitude, t):
    """Plain-JAX reference mirroring the PyTorch module (for verification)."""
    imp = jnp.mean(jnp.abs(x.astype(jnp.float32)), axis=0, keepdims=True)
    new_mag = (float(t) * magnitude + imp) / (float(t) + 1.0)
    flat = jnp.sort(new_mag.reshape(-1))
    n = flat.shape[0]
    idx = max(int(sparsity * n - 1), 0)
    thr = flat[idx]
    mask = new_mag >= thr
    out = x * mask.astype(x.dtype)
    return out, mask, new_mag


if __name__ == "__main__":
    key = jax.random.PRNGKey(0)
    N, C, H, W = 2, 4, 16, 16          # small NCHW activation
    sparsity = 0.5

    kx, = jax.random.split(key, 1)
    # ReLU-like non-negative activations (module is typically used post-ReLU).
    x = jax.nn.relu(jax.random.normal(kx, (N, C, H, W), dtype=jnp.float32))

    # Deterministic "module state": fresh callback at step t=0 after initialize().
    mask0 = jnp.ones((1, C, H, W), dtype=jnp.bool_)
    magnitude0 = jnp.zeros((1, C, H, W), dtype=jnp.float32)
    t0 = 0

    out, new_mask, new_mag, t1 = magnitude_pruning_forward(
        x, sparsity, mask0, magnitude0, t0
    )
    jax.block_until_ready(out)
    jax.block_until_ready(new_mask)
    jax.block_until_ready(new_mag)

    # Verify against the plain-JAX reference of the PyTorch semantics.
    out_ref, mask_ref, mag_ref = _reference(x, sparsity, magnitude0, t0)
    assert jnp.allclose(out, out_ref, atol=1e-6), "output mismatch"
    assert bool(jnp.all(new_mask == mask_ref)), "mask mismatch"
    assert jnp.allclose(new_mag, mag_ref, atol=1e-6), "magnitude mismatch"
    assert t1 == 1

    print("KERNEL_OK")
</pallas_src>

<mosaic_0001>
module attributes {stable_mosaic.version = 11 : i64} {
  func.func @_magnitude_update_kernel(%arg0: i32, %arg1: memref<2xf32, #tpu.memory_space<smem>>, %arg2: memref<2x512xf32, #tpu.memory_space<vmem>>, %arg3: memref<1x512xf32, #tpu.memory_space<vmem>>, %arg4: memref<1x512xf32, #tpu.memory_space<vmem>>) attributes {dimension_semantics = [#tpu.dimension_semantics<parallel>], iteration_bounds = array<i64: 2>, scalar_prefetch = 0 : i64, scratch_operands = 0 : i64, tpu.core_type = #tpu.core_type<tc>, window_params = [{transform_indices = @transform_0, window_bounds = array<i64: 2>}, {transform_indices = @transform_1, window_bounds = array<i64: 2, 512>}, {transform_indices = @transform_2, window_bounds = array<i64: 1, 512>}, {transform_indices = @transform_3, window_bounds = array<i64: 1, 512>}]} {
    %c0 = arith.constant 0 : index
    %0 = memref.load %arg1[%c0] : memref<2xf32, #tpu.memory_space<smem>>
    %c1 = arith.constant 1 : index
    %1 = memref.load %arg1[%c1] : memref<2xf32, #tpu.memory_space<smem>>
    %c0_0 = arith.constant 0 : index
    %c0_1 = arith.constant 0 : index
    %2 = vector.load %arg2[%c0_0, %c0_1] : memref<2x512xf32, #tpu.memory_space<vmem>>, vector<2x512xf32>
    %3 = math.absf %2 : vector<2x512xf32>
    %cst = arith.constant dense<0.000000e+00> : vector<512xf32>
    %4 = vector.multi_reduction <add>, %3, %cst [0] : vector<2x512xf32> to vector<512xf32>
    %5 = vector.shape_cast %4 : vector<512xf32> to vector<1x512xf32>
    %cst_2 = arith.constant 2.000000e+00 : f32
    %6 = vector.broadcast %cst_2 : f32 to vector<1x512xf32>
    %7 = arith.divf %5, %6 : vector<1x512xf32>
    %c0_3 = arith.constant 0 : index
    %c0_4 = arith.constant 0 : index
    %8 = vector.load %arg3[%c0_3, %c0_4] : memref<1x512xf32, #tpu.memory_space<vmem>>, vector<1x512xf32>
    %9 = vector.broadcast %0 : f32 to vector<1x512xf32>
    %10 = arith.mulf %9, %8 : vector<1x512xf32>
    %11 = vector.broadcast %1 : f32 to vector<1x512xf32>
    %12 = arith.mulf %11, %7 : vector<1x512xf32>
    %13 = arith.addf %10, %12 : vector<1x512xf32>
    %c0_5 = arith.constant 0 : index
    %c0_6 = arith.constant 0 : index
    %14 = vector.load %arg4[%c0_5, %c0_6] : memref<1x512xf32, #tpu.memory_space<vmem>>, vector<1x512xf32>
    tpu.vector_store %arg4[%c0_5, %c0_6], %13 {strides = array<i32>} : memref<1x512xf32, #tpu.memory_space<vmem>>, vector<1x512xf32>,
    return
  }
  func.func @transform_0(%arg0: i32) -> i32 {
    %c0_i32 = arith.constant 0 : i32
    %c0_i32_0 = arith.constant 0 : i32
    return %c0_i32 : i32
  }
  func.func @transform_1(%arg0: i32) -> (i32, i32) {
    %c0_i32 = arith.constant 0 : i32
    %c0_i32_0 = arith.constant 0 : i32
    return %c0_i32, %arg0 : i32, i32
  }
  func.func @transform_2(%arg0: i32) -> (i32, i32) {
    %c0_i32 = arith.constant 0 : i32
    %c0_i32_0 = arith.constant 0 : i32
    return %c0_i32, %arg0 : i32, i32
  }
  func.func @transform_3(%arg0: i32) -> (i32, i32) {
    %c0_i32 = arith.constant 0 : i32
    %c0_i32_0 = arith.constant 0 : i32
    return %c0_i32, %arg0 : i32, i32
  }
}

</mosaic_0001>

<bundles_post_ra>
// kernel: tpu_custom_call.1
= control target key start
LH: loop header
LB: loop body
LE: loop exit
PB: predicated region body
PF: predicated region fallthrough
CT: control target
= control target key end

     0   :  { %8 = vsyncpa [#allocation5], 0  ;;  %s967_s0 = inlined_call_operand.hbm [shape: f32[2], index: 0, kind: input, shape index: {}]   ;;  %s968_s1 = inlined_call_operand.hbm [shape: f32[2,1024], index: 1, kind: input, shape index: {}]   ;;  %s969_s2 = inlined_call_operand.hbm [shape: f32[1,1024], index: 2, kind: input, shape index: {}]   ;;  %s970_s3 = inlined_call_operand.hbm [shape: f32[1,1024], index: 3, kind: output, shape index: {}]  }
   0x1   :  { %9 = vsyncpa [#allocation3], 0 }
   0x2   :  { %11 = vsyncpa [#allocation3 + $0x1], 0 }
   0x3   :  { %12 = vsyncpa [#allocation8], 0 }
   0x4   :  { %14 = vsyncpa [#allocation8 + $0x1], 0 }
   0x5   :  { %15 = vsyncpa [#allocation4], 0 }
   0x6   :  { %17 = vsyncpa [#allocation4 + $0x1], 0  ;;  %s726_s12 = smov 0   ;;  %s728_s13 = smov 0  }
   0x7   :  { %s730_s14 = smov 0   ;;  %s732_s15 = smov 0  }
   0x8 LB: > { %s747_s16 = sadd.s32 4294967295, %s698_s15   ;;  %s463_s17 = sadd.s32 4294967294, %s698_s15   ;;  %s698_s15 = sphi %s732_s15, %s992_s15   ;;  %s694_s14 = sphi %s730_s14, %s991_s14   ;;  %s690_s13 = sphi %s728_s13, %s990_s13   ;;  %s686_s12 = sphi %s726_s12, %s989_s12  }
   0x9   : > { %s751_s18 = sadd.s32 1, %s698_s15   ;;  %s51_s19 = sadd.s32 1, %s694_s14 }
   0xa   : > { %s48_s20 = ssub.s32 %s698_s15, %s751_s18  ;;  %p58_p0 = scmp.ne.s32.totalorder %s694_s14, %s690_s13 }
   0xb   : > { %p49_p1 = scmp.eq.s32.totalorder %s48_s20, 0  ;;  %p64_p2 = scmp.ne.s32.totalorder %s690_s13, %s686_s12 }
   0xc   : > { %p971_p3 = scmp.eq.s32.totalorder %s747_s16, 0  ;;  %p114_p4 = scmp.eq.s32.totalorder %s747_s16, 1 }
   0xd   : > { %s763_s21 = scalar_select %p49_p1, %s694_s14, %s51_s19  }
   0xe   : > { %p767_p5 = por %p971_p3, %p64_p2  ;;  %p774_p6 = por %p114_p4, %p58_p0 }
   0xf   : > { %p120_p7 = scmp.eq.s32.totalorder %s463_s17, 1  ;;  %p464_p8 = scmp.ge.s32.totalorder %s698_s15, 1 }
  0x10   : > { %s975_s22 = scalar_select %p767_p5, 1, 0 }
  0x11   : > { %s976_s23 = scalar_select %p774_p6, 1, 0 }
  0x12   : > { %p127_p9 = scmp.lt.s32.totalorder %s698_s15, 3  ;;  %p780_p10 = por %p120_p7, %p64_p2 }
  0x13   : > { %p59_p13 = scmp.eq.s32.totalorder %s698_s15, 0  ;;  %p513_p1 = scmp.lt.s32.totalorder %s698_s15, 2 }
  0x14   : > { %s977_s24 = scalar_select %p780_p10, 1, 0 }
  0x15   : > { %p784_p11 = pnand %p464_p8, %p127_p9  ;;  %s794_s26 = sand.u32 1, %s694_s14  }
  0x16   : > { %p799_p3 = por %p59_p13, %p58_p0  ;;  %p980_p2 = scmp.eq.s32.totalorder %s747_s16, 0 }
  0x17   : > { %s978_s25 = scalar_select %p784_p11, 1, 0 }
  0x18   : > { %p497_p4 = pneg %p784_p11  ;;  %s467_s28 = sshll.u32 %s794_s26, 3 }
  0x19   : > { %s484_s29 = sshll.u32 %s698_s15, 7  ;;  %s551_s8 = scalar_lea.hbm %s967_s0, 16 }
  0x1a   : > { %p498_p7 = pnand %p497_p4, %p980_p2  ;;  %s810_s5 = scalar_lea.hbm %s968_s1, %s484_s29 }
  0x1b   : > { %p552_p0 = scmp.ne.s32.totalorder %s967_s0, %s551_s8  ;;  %p558_p4 = scmp.lt.u32.totalorder %s551_s8, %s967_s0 }
  0x1c   : > { %p553_p8 = pneg %p498_p7 }
  0x1e   : > { %p554_p9 = pnand %p553_p8, %p552_p0 }
  0x20   : > { %p555_p13 = pneg %p554_p9 }
  0x22   : > { %p560_p2 = pnand %p558_p4, %p555_p13 }
  0x24   : > { %563 = shalt.err (!%p560_p2)
}
  0x25   : > { %s700_s19 = smov [#allocation2]   ;;  %s153_s30 = scalar_lea.vmem [#allocation6], %s467_s28 }
  0x26   : > { %500 = dma.hbm_to_smem (!%p498_p7), %s967_s0, 16, %s700_s19, [#allocation5]  }
  0x27   : > { %s161_s4 = sshll.u32 %s153_s30, 4  ;;  %p828_p0 = pnand %p513_p1, %p799_p3  ;;  %s832_s4 = int_to_ptr.vmem [resolvable:$true] %s161_s4 }
  0x28   : > { %s470_s7 = sshll.u32 %s794_s26, 2  ;;  %s150_s8 = scalar_lea.sflag [#allocation3], %s794_s26 }
  0x29   : > { %s564_s9 = scalar_lea.hbm %s810_s5, 128  ;;  %p566_p9 = pneg %p828_p0 }
  0x2a   : > { %p565_p8 = scmp.ne.s32.totalorder %s810_s5, %s564_s9  ;;  %s569_s10 = scalar_lea.hbm %s968_s1, 256 }
  0x2b   : > { %p570_p3 = scmp.lt.u32.totalorder %s810_s5, %s968_s1  ;;  %p571_p1 = scmp.lt.u32.totalorder %s569_s10, %s564_s9 }
  0x2c   : > { %p567_p7 = pnand %p566_p9, %p565_p8  ;;  %p573_p2 = scmp.lt.u32.totalorder %s564_s9, %s810_s5 }
  0x2d   : > { %p572_p4 = por %p571_p1, %p570_p3 }
  0x2e   : > { %p568_p13 = pneg %p567_p7 }
  0x2f   : > { %p574_p12 = por %p573_p2, %p572_p4 }
  0x31   : > { %p575_p10 = pnand %p574_p12, %p568_p13 }
  0x33   : > { %578 = shalt.err (!%p575_p10)
}
  0x34   : > { %s579_s19 = scalar_lea.vmem %s832_s4, 128  ;;  %s701_s20 = smov [#allocation6]  }
  0x35   : > { %p580_p8 = scmp.ne.s32.totalorder %s832_s4, %s579_s19  ;;  %s584_s29 = sshll.u32 %s701_s20, 4  ;;  %s585_s29 = int_to_ptr.vmem [resolvable:$false] %s584_s29 }
  0x36   : > { %s586_s30 = scalar_lea.vmem %s585_s29, 256  ;;  %p587_p5 = scmp.lt.s32.totalorder %s832_s4, %s585_s29 }
  0x37   : > { %p582_p7 = pnand %p580_p8, %p566_p9  ;;  %p588_p3 = scmp.lt.s32.totalorder %s586_s30, %s579_s19 }
  0x39   : > { %p583_p6 = pneg %p582_p7  ;;  %p589_p1 = por %p588_p3, %p587_p5 }
  0x3b   : > { %p590_p4 = pnand %p589_p1, %p583_p6 }
  0x3d   : > { %593 = shalt.err (!%p590_p4)
}
  0x3e   : > { %504 = dma.hbm_to_vmem [thread:$0]  (!%p828_p0), %s810_s5, 128, %s832_s4, %s150_s8  }
  0x3f   : > { %s485_s9 = sshll.u32 %s698_s15, 6  ;;  %s172_s11 = scalar_lea.vmem [#allocation7], %s470_s7 }
  0x40   : > { %s865_s10 = scalar_lea.hbm %s969_s2, %s485_s9  ;;  %s180_s17 = sshll.u32 %s172_s11, 4  ;;  %s181_s17 = int_to_ptr.vmem [resolvable:$true] %s180_s17 }
  0x41   : > { %s169_s19 = scalar_lea.sflag [#allocation8], %s794_s26  ;;  %s594_s20 = scalar_lea.hbm %s865_s10, 64 }
  0x42   : > { %p595_p5 = scmp.ne.s32.totalorder %s865_s10, %s594_s20  ;;  %s599_s8 = scalar_lea.hbm %s969_s2, 128 }
  0x43   : > { %p600_p12 = scmp.lt.u32.totalorder %s865_s10, %s969_s2  ;;  %p601_p13 = scmp.lt.u32.totalorder %s599_s8, %s594_s20 }
  0x44   : > { %p597_p6 = pnand %p595_p5, %p566_p9  ;;  %p603_p8 = scmp.lt.u32.totalorder %s594_s20, %s865_s10 }
  0x45   : > { %p602_p2 = por %p601_p13, %p600_p12 }
  0x46   : > { %p598_p10 = pneg %p597_p6 }
  0x47   : > { %p604_p7 = por %p603_p8, %p602_p2 }
  0x49   : > { %p605_p3 = pnand %p604_p7, %p598_p10 }
  0x4b   : > { %608 = shalt.err (!%p605_p3)
}
  0x4c   : > { %s609_s26 = scalar_lea.vmem %s181_s17, 64  ;;  %s702_s7 = smov [#allocation7]  }
  0x4d   : > { %p610_p1 = scmp.ne.s32.totalorder %s181_s17, %s609_s26  ;;  %s614_s9 = sshll.u32 %s702_s7, 4  ;;  %s615_s9 = int_to_ptr.vmem [resolvable:$false] %s614_s9 }
  0x4e   : > { %s616_s27 = scalar_lea.vmem %s615_s9, 128  ;;  %p617_p6 = scmp.lt.s32.totalorder %s181_s17, %s615_s9 }
  0x4f   : > { %p612_p4 = pnand %p610_p1, %p566_p9  ;;  %p618_p11 = scmp.lt.s32.totalorder %s616_s27, %s609_s26 }
  0x51   : > { %p613_p5 = pneg %p612_p4  ;;  %p619_p12 = por %p618_p11, %p617_p6 }
  0x53   : > { %p620_p13 = pnand %p619_p12, %p613_p5 }
  0x55   : > { %623 = shalt.err (!%p620_p13)
}
  0x56   : > { %507 = dma.hbm_to_vmem [thread:$0]  (!%p828_p0), %s865_s10, 64, %s181_s17, %s169_s19  }
  0x57   : > { %p982_p10 = scmp.ne.s32.totalorder %s978_s25, 0 }
  0x58   : > { %p983_p2 = scmp.eq.s32.totalorder (!%p982_p10), %s747_s16, 0 }
  0x59   : > { %189 = sbr.rel (%p982_p10) target bundleno = 158 (0x9e), region = 32 }
  0x60   : > { %669 = dma.done.wait (%p983_p2), [#allocation5], 16   ;;  %p984_p9 = pmov %p983_p2 }
  0x61   : > { %s896_s28 = sand.u32 1, %s690_s13   ;;  %p985_p11 = scmp.ne.s32.totalorder %s975_s22, 0 }
  0x62   : > { %671 = vsyncadd (%p984_p9), [#allocation5], 4294967280  ;;  %s475_s11 = sshll.u32 %s896_s28, 3  ;;  %s196_s20 = scalar_lea.sflag [#allocation3], %s896_s28 }
  0x63   : > { %s199_s6 = scalar_lea.vmem [#allocation6], %s475_s11 }
  0x64   : > { %673 = dma.done.wait (%p985_p11), %s196_s20, 128  }
  0x65   : > { %675 = vsyncadd (%p985_p11), %s196_s20, 4294967168  ;;  %s476_s25 = sshll.u32 %s896_s28, 2  ;;  %s205_s10 = scalar_lea.sflag [#allocation8], %s896_s28 }
  0x66   : > { %s908_s17 = scalar_lea.vmem [#allocation7], %s476_s25 }
  0x67   : > { %677 = dma.done.wait (%p985_p11), %s205_s10, 64  }
  0x68   : > { %679 = vsyncadd (%p985_p11), %s205_s10, 4294967232 }
  0x69   : > { %213 = sfence }
  0x6a   : > { %v242_v0 = vld [vmem:[%s199_s6] sm:$0xff]  ;;  %v249_v1 = vlaneseq  ;;  %v703_v3 = vmov 1983009808   ;;  %vm266_vm0 = vcmask 1041408   ;;  %s478_s22 = sld [smem:[#allocation2 + $0x1]]  ;;  %s240_s19 = sld [smem:[#allocation2]] }
  0x6b   : > { %v243_v2 = vand.u32 2147483647, %v242_v0  ;;  %v247_v4 = vunpack.c.l.s4 %v703_v3  ;;  %v704_v31 = vmov 1966171168   ;;  %v300_v56 = vld [vmem:[%s908_s17] sm:$0xf] }
  0x6c   : > { %v250_v5 = vshrl.u32 %v249_v1, 7  ;;  %v315_v32 = vunpack.c.l.s4 %v704_v31  ;;  %s236_s5 = scalar_lea.vmem [#allocation9], %s476_s25  ;;  %s486_s8 = sshll.u32 %s747_s16, 6  ;;  %vm340_vm1 = vcmp.lt.s32.totalorder %v249_v1, 512 }
  0x6d   : > { %v245_v6 = vcombine.high %v243_v2, %v243_v2  ;;  %v248_v7 = vunpack.c.0.s8 %v247_v4  ;;  %s358_s4 = sshll.u32 %s236_s5, 4  ;;  %s925_s26 = scalar_lea.hbm %s970_s3, %s486_s8  ;;  %s920_s4 = int_to_ptr.vmem [resolvable:$true] %s358_s4 }
  0x6e   : > { %v316_v42 = vunpack.c.0.s8 %v315_v32  ;;  %s344_s7 = scalar_lea.sflag [#allocation4], %s896_s28  ;;  %s624_s9 = scalar_lea.vmem %s920_s4, 64 }
  0x6f   : > { %v251_v8 = vsub.s32 %v248_v7, %v250_v5  ;;  %p625_p0 = scmp.ne.s32.totalorder %s920_s4, %s624_s9  ;;  %p986_p8 = scmp.ne.s32.totalorder %s976_s23, 0 }
  0x70   : > { %v303_v41 = vstv %s478_s22  ;;  %v319_v53 = vsub.s32 %v316_v42, %v250_v5  ;;  %v301_v57 = vstv %s240_s19  ;;  %s705_s16 = smov [#allocation9]  }
  0x71   : > { %v252_v9 = vrot.slane %v243_v2, %v251_v8  ;;  %v259_v10 = vrot.slane %v245_v6, %v251_v8  ;;  %v302_v60 = vmul.f32 %v301_v57, %v300_v56  ;;  %p626_p7 = pnand %p625_p0, %p986_p8  ;;  %s628_s27 = sshll.u32 %s705_s16, 4  ;;  %s629_s27 = int_to_ptr.vmem [resolvable:$false] %s628_s27 }
  0x72   : > { %s630_s11 = scalar_lea.vmem %s629_s27, 128  ;;  %p631_p1 = scmp.lt.s32.totalorder %s920_s4, %s629_s27 }
  0x73   : > { %v260_v11 = vcombine.high %v252_v9, %v252_v9  ;;  %v261_v12 = vcombine.high %v259_v10, %v259_v10  ;;  %v267_v13 = vsel %vm266_vm0, %v252_v9, 0.0  ;;  %v281_v14 = vsel %vm266_vm0, %v259_v10, 0.0  ;;  %p627_p3 = pneg %p626_p7  ;;  %p632_p4 = scmp.lt.s32.totalorder %s630_s11, %s624_s9 }
  0x74   : > { %v268_v15 = vrot.slane %v267_v13, 4  ;;  %v282_v16 = vrot.slane %v281_v14, 4 }
  0x75   : > { %v274_v17 = vsel %vm266_vm0, %v260_v11, 0.0  ;;  %v288_v18 = vsel %vm266_vm0, %v261_v12, 0.0  ;;  %p633_p5 = por %p632_p4, %p631_p1 }
  0x76   : > { %v269_v19 = vadd.f32 %v268_v15, %v267_v13  ;;  %v275_v20 = vrot.slane %v274_v17, 4  ;;  %v283_v21 = vadd.f32 %v282_v16, %v281_v14  ;;  %v289_v22 = vrot.slane %v288_v18, 4 }
  0x77   : > { %p634_p6 = pnand %p633_p5, %p627_p3 }
  0x78   : > { %v270_v23 = vrot.slane %v269_v19, 2  ;;  %v276_v24 = vadd.f32 %v275_v20, %v274_v17  ;;  %v284_v25 = vrot.slane %v283_v21, 2  ;;  %v290_v26 = vadd.f32 %v289_v22, %v288_v18 }
  0x7a   : > { %v271_v27 = vadd.f32 %v270_v23, %v269_v19  ;;  %v277_v28 = vrot.slane %v276_v24, 2  ;;  %v285_v29 = vadd.f32 %v284_v25, %v283_v21  ;;  %v291_v30 = vrot.slane %v290_v26, 2 }
  0x7c   : > { %v272_v33 = vrot.slane %v271_v27, 1  ;;  %v278_v34 = vadd.f32 %v277_v28, %v276_v24  ;;  %v286_v35 = vrot.slane %v285_v29, 1  ;;  %v292_v36 = vadd.f32 %v291_v30, %v290_v26 }
  0x7e   : > { %v273_v37 = vadd.f32 %v272_v33, %v271_v27  ;;  %v279_v38 = vrot.slane %v278_v34, 1  ;;  %v287_v39 = vadd.f32 %v286_v35, %v285_v29  ;;  %v293_v40 = vrot.slane %v292_v36, 1 }
  0x80   : > { %v280_v43 = vadd.f32 %v279_v38, %v278_v34  ;;  %v294_v44 = vadd.f32 %v293_v40, %v292_v36  ;;  %v296_v45 = vmul.f32 0.5, %v273_v37  ;;  %v298_v46 = vmul.f32 0.5, %v287_v39 }
  0x82   : > { %v297_v47 = vmul.f32 0.5, %v280_v43  ;;  %v299_v48 = vmul.f32 0.5, %v294_v44  ;;  %v304_v49 = vmul.f32 %v303_v41, %v296_v45  ;;  %v306_v50 = vmul.f32 %v303_v41, %v298_v46 }
  0x84   : > { %v305_v51 = vmul.f32 %v303_v41, %v297_v47  ;;  %v307_v52 = vmul.f32 %v303_v41, %v299_v48 }
  0x86   : > { %v312_v54 = vcombine.low %v304_v49, %v305_v51  ;;  %v313_v55 = vcombine.low %v306_v50, %v307_v52 }
  0x88   : > { %v320_v58 = vrot.slane %v312_v54, %v319_v53  ;;  %v327_v59 = vrot.slane %v313_v55, %v319_v53 }
  0x8a   : > { %v328_v61 = vcombine.low %v320_v58, %v327_v59 }
  0x8c   : > { %v335_v62 = vrot.slane %v328_v61, %v319_v53 }
  0x8e   : > { %v337_v63 = vadd.f32 %v335_v62, %v302_v60 }
  0x90   : > { %342 = vst.msk [vmem:[%s236_s5] sm:$0xf] %vm340_vm1, %v337_v63 }
  0x91   : > { %637 = shalt.err (!%p634_p6)
}
  0x92   : > { %s638_s28 = scalar_lea.hbm %s925_s26, 64  ;;  %s642_s25 = scalar_lea.hbm %s970_s3, 128 }
  0x93   : > { %p639_p12 = scmp.ne.s32.totalorder %s925_s26, %s638_s28  ;;  %p643_p2 = scmp.lt.u32.totalorder %s925_s26, %s970_s3 }
  0x94   : > { %p644_p9 = scmp.lt.u32.totalorder %s642_s25, %s638_s28  ;;  %p646_p0 = scmp.lt.u32.totalorder %s638_s28, %s925_s26 }
  0x95   : > { %p640_p13 = pnand %p639_p12, %p986_p8 }
  0x96   : > { %p645_p11 = por %p644_p9, %p643_p2 }
  0x97   : > { %p641_p10 = pneg %p640_p13 }
  0x98   : > { %p647_p7 = por %p646_p0, %p645_p11 }
  0x9a   : > { %p648_p3 = pnand %p647_p7, %p641_p10 }
  0x9c   : > { %651 = shalt.err (!%p648_p3)
}
  0x9d   : > { %495 = dma.vmem_to_hbm [thread:$0]  (%p986_p8), %s920_s4, 64, %s925_s26, %s344_s7  }
  0x9e PF: > { %s370_s22 = sand.u32 1, %s686_s12   ;;  %p987_p1 = scmp.ne.s32.totalorder %s977_s24, 0 }
  0x9f   : > { %p988_p4 = scmp.ge.s32.totalorder %s698_s15, 2  ;;  %s371_s19 = scalar_lea.sflag [#allocation4], %s370_s22 }
  0xa1   : > { %p509_p5 = pnand %p988_p4, %p987_p1 }
  0xa3   : > { %681 = dma.done.wait (!%p509_p5), %s371_s19, 64  }
  0xa4   : > { %683 = vsyncadd (!%p509_p5), %s371_s19, 4294967232  ;;  %p20_p6 = scmp.ge.s32.totalorder %s751_s18, 4   ;;  %s989_s12 = smov %s690_s13 }
  0xa5   : > { %s990_s13 = smov %s694_s14  ;;  %s991_s14 = smov %s763_s21 }
  0xa6   : > { %s992_s15 = smov %s751_s18  ;;  %22 = sbr.rel (!%p20_p6) target bundleno = 8 (0x8), region = 95 }
  0xad   :  { %376 = vsyncpa [#allocation3], 1 }
  0xae   :  { %378 = vsyncpa [#allocation3 + $0x1], 1 }
  0xaf   :  { %379 = vsyncpa [#allocation8], 1 }
  0xb0   :  { %381 = vsyncpa [#allocation8 + $0x1], 1 }
  0xb1   :  { %382 = vsyncpa [#allocation4], 1 }
  0xb2   :  { %384 = vsyncpa [#allocation4 + $0x1], 1 }
  0xb3   :  { %385 = vsyncpa [#allocation5], 1 }
  0xb4   :  { %387 = vsyncpa [#allocation5 + $0x1], 1 }

</bundles_post_ra>
